<compile_context>
chip_gen: v6e
topology: v6e:2x2x1
jax: 0.10.0
libtpu: 0.0.40
codegen_flags: <defaults>
</compile_context>

<pallas_src>
import jax
import jax.numpy as jnp
from jax.experimental import pallas as pl
from jax.experimental.pallas import tpu as pltpu


def _round_up(x, m):
    return ((x + m - 1) // m) * m


def _pad_feature(d, align=256):
    # Lane dims must be multiples of 128; 256-align larger dims so the
    # 256-wide MXU on v6e/v7x runs full passes (harmless on v5e).
    if d <= 128:
        return 128
    return _round_up(d, align)


def _vmem_budget_bytes():
    # ~85% of per-core VMEM capacity; conservative v7x-sized fallback if the
    # hardware query is unavailable.
    try:
        cap = getattr(pltpu.get_tpu_info(), "vmem_capacity_bytes", None)
    except Exception:
        cap = None
    if not cap:
        cap = 64 << 20
    return int(cap * 0.85)


def _mlp_kernel(x_ref, w1_ref, b1_ref, w2_ref, b2_ref, o_ref, acc_ref):
    """One (batch-tile, hidden-tile) step of fc1 -> ReLU -> fc2."""
    k = pl.program_id(1)

    @pl.when(k == 0)
    def _init():
        acc_ref[...] = jnp.zeros_like(acc_ref)

    # fc1 partial: [TB, In_p] @ [In_p, TH] -> f32, + bias, ReLU.  Exact per
    # hidden block since the In contraction is fully resident.
    h = jnp.dot(x_ref[...], w1_ref[...], preferred_element_type=jnp.float32)
    h = jnp.maximum(h + b1_ref[...], 0.0)
    # fc2 partial: [TB, TH] @ [TH, Out_p], accumulated in f32.
    acc_ref[...] += jnp.dot(h.astype(w2_ref.dtype), w2_ref[...],
                            preferred_element_type=jnp.float32)

    @pl.when(k == pl.num_programs(1) - 1)
    def _finalize():
        o_ref[...] = (acc_ref[...] + b2_ref[...]).astype(o_ref.dtype)


def prepare_params(w1, b1, w2, b2, *, compute_dtype=jnp.bfloat16,
                   feature_align=256):
    """One-time transpose/pad/cast of nn.Linear params (PyTorch layout:
    w1 [H, In], w2 [Out, H]) into MXU-friendly [in, out] padded slabs."""
    H, In = w1.shape
    Out = w2.shape[0]
    cdt = jnp.dtype(compute_dtype)
    itm = cdt.itemsize

    In_p = _pad_feature(In, feature_align)
    Out_p = _pad_feature(Out, feature_align)
    H_p = _pad_feature(H, feature_align)

    # Hidden-dim streaming decision: if fully-resident weights exceed ~60% of
    # the per-generation VMEM budget, tile H so each (double-buffered) W1/W2
    # slab fits.  Padding is zero-filled, so extra hidden lanes contribute 0.
    budget = _vmem_budget_bytes()
    weight_share = int(0.6 * budget)
    if (In_p * H_p + H_p * Out_p) * itm <= weight_share:
        TH = H_p                      # fully resident, single hidden step
    else:
        TH = (weight_share // (2 * itm * (In_p + Out_p))) // 128 * 128
        TH = max(128, min(TH, H_p))
        H_p = _round_up(H_p, TH)      # exact tiling of the hidden axis

    w1p = jnp.zeros((In_p, H_p), cdt).at[:In, :H].set(w1.T.astype(cdt))
    b1p = jnp.zeros((1, H_p), jnp.float32).at[0, :H].set(b1.astype(jnp.float32))
    w2p = jnp.zeros((H_p, Out_p), cdt).at[:H, :Out].set(w2.T.astype(cdt))
    b2p = jnp.zeros((1, Out_p), jnp.float32).at[0, :Out].set(b2.astype(jnp.float32))

    return dict(w1=w1p, b1=b1p, w2=w2p, b2=b2p,
                In=In, H=H, Out=Out,
                In_p=In_p, H_p=H_p, Out_p=Out_p, TH=TH,
                compute_dtype=cdt)


def shallow_mlp_apply(params, x, *, block_b=512):
    """Fused forward: y = relu(x @ W1 + b1) @ W2 + b2.  x: [B, In]."""
    B, In = x.shape
    if In != params["In"]:
        raise ValueError(f"expected In={params['In']}, got {In}")
    In_p, H_p, Out_p = params["In_p"], params["H_p"], params["Out_p"]
    Out, TH = params["Out"], params["TH"]
    cdt = params["compute_dtype"]
    out_dtype = x.dtype
    w1p, b1p, w2p, b2p = params["w1"], params["b1"], params["w2"], params["b2"]
    n_h = H_p // TH

    # Per-call x pad/cast only when actually needed (skip the extra HBM pass
    # when the feature dim is already lane-aligned and dtype matches).
    if In == In_p and x.dtype == cdt:
        xp = x
    else:
        xp = jnp.zeros((B, In_p), cdt).at[:, :In].set(x.astype(cdt))

    budget = _vmem_budget_bytes()
    itm = jnp.dtype(cdt).itemsize
    out_itm = jnp.dtype(out_dtype).itemsize
    w_bufs = 1 if n_h == 1 else 2            # resident weights single-buffered
    resident = ((In_p * TH + TH * Out_p) * itm * w_bufs
                + (TH + Out_p) * 4 * 2)      # biases (f32)

    # Batch tile: no over-padding of B; >= 2 grid steps when B > 8 so both
    # v7x TensorCores get work; shrink if the VMEM budget demands it.
    TB = min(block_b, _round_up(B, 8))
    if B > 8:
        TB = min(TB, _round_up((B + 1) // 2, 8))

    def _act_bytes(tb):
        return (2 * tb * In_p * itm           # x double buffer
                + 2 * tb * Out_p * out_itm    # out double buffer
                + tb * Out_p * 4              # f32 accumulator scratch
                + 2 * tb * TH * 4)            # hidden intermediate headroom

    while TB > 8 and resident + _act_bytes(TB) > budget:
        TB = max(8, _round_up(TB // 2, 8))

    grid = (pl.cdiv(B, TB), n_h)

    flops = 2 * B * (In_p * H_p + H_p * Out_p)
    bytes_accessed = int(
        xp.size * xp.dtype.itemsize
        + w1p.size * w1p.dtype.itemsize + b1p.size * b1p.dtype.itemsize
        + w2p.size * w2p.dtype.itemsize + b2p.size * b2p.dtype.itemsize
        + B * Out_p * out_itm)

    def _run(use_single_buffer):
        def spec(shape, index_map, invariant):
            if invariant and use_single_buffer:
                return pl.BlockSpec(shape, index_map,
                                    pipeline_mode=pl.Buffered(1))
            return pl.BlockSpec(shape, index_map)

        w_inv = n_h == 1   # weights are grid-invariant only when fully resident
        in_specs = [
            pl.BlockSpec((TB, In_p), lambda i, k: (i, 0)),        # x (tiled)
            spec((In_p, TH), lambda i, k: (0, k), w_inv),         # w1
            spec((1, TH), lambda i, k: (0, k), w_inv),            # b1
            spec((TH, Out_p), lambda i, k: (k, 0), w_inv),        # w2
            spec((1, Out_p), lambda i, k: (0, 0), True),          # b2
        ]
        return pl.pallas_call(
            _mlp_kernel,
            out_shape=jax.ShapeDtypeStruct((B, Out_p), out_dtype),
            grid=grid,
            in_specs=in_specs,
            out_specs=pl.BlockSpec((TB, Out_p), lambda i, k: (i, 0)),
            scratch_shapes=[pltpu.VMEM((TB, Out_p), jnp.float32)],
            compiler_params=pltpu.CompilerParams(
                dimension_semantics=("parallel", "arbitrary"),
                vmem_limit_bytes=budget),
            cost_estimate=pl.CostEstimate(
                flops=flops, transcendentals=0,
                bytes_accessed=bytes_accessed),
        )(xp, w1p, b1p, w2p, b2p)

    try:
        y_p = _run(True)
    except Exception:
        # pl.Buffered(1) / pipeline_mode support varies across JAX versions;
        # fall back to default double-buffering rather than failing to run.
        y_p = _run(False)

    # Zero-padded weight/bias lanes never contaminate valid outputs; only the
    # feature slice (a no-op when Out is already aligned) is needed.
    return y_p if Out == Out_p else y_p[:, :Out]


def shallow_mlp(x, w1, b1, w2, b2, *, compute_dtype=jnp.bfloat16,
                block_b=512, feature_align=256):
    """One-shot convenience wrapper (prepares params per call)."""
    params = prepare_params(w1, b1, w2, b2, compute_dtype=compute_dtype,
                            feature_align=feature_align)
    return shallow_mlp_apply(params, x, block_b=block_b)


if __name__ == "__main__":
    # ShallowMLP(shape=(in, hidden, out))
    in_shape, hidden_shape, out_shape = 16, 32, 8
    batch = 8

    key = jax.random.PRNGKey(0)
    kx, kw1, kb1, kw2, kb2 = jax.random.split(key, 5)

    x = jax.random.normal(kx, (batch, in_shape), dtype=jnp.float32)

    # nn.Linear-style init (uniform in [-1/sqrt(fan_in), 1/sqrt(fan_in)]).
    bound1 = 1.0 / (in_shape ** 0.5)
    w1 = jax.random.uniform(kw1, (hidden_shape, in_shape),
                            minval=-bound1, maxval=bound1, dtype=jnp.float32)
    b1 = jax.random.uniform(kb1, (hidden_shape,),
                            minval=-bound1, maxval=bound1, dtype=jnp.float32)
    bound2 = 1.0 / (hidden_shape ** 0.5)
    w2 = jax.random.uniform(kw2, (out_shape, hidden_shape),
                            minval=-bound2, maxval=bound2, dtype=jnp.float32)
    b2 = jax.random.uniform(kb2, (out_shape,),
                            minval=-bound2, maxval=bound2, dtype=jnp.float32)

    # Plain-JAX f32 reference (identical math to the PyTorch forward).
    y_ref = jnp.maximum(x @ w1.T + b1, 0.0) @ w2.T + b2

    # Default fast path: params prepared once, bf16 MXU compute, f32 epilogue.
    params = prepare_params(w1, b1, w2, b2)
    y = jax.block_until_ready(shallow_mlp_apply(params, x))
    assert y.shape == (batch, out_shape)
    assert jnp.allclose(y, y_ref, atol=5e-2, rtol=5e-2), "bf16 path mismatch"

    # Exact / debug path: f32 MXU compute, tight tolerance.
    y32 = jax.block_until_ready(
        shallow_mlp(x, w1, b1, w2, b2, compute_dtype=jnp.float32))
    assert y32.shape == (batch, out_shape)
    assert jnp.allclose(y32, y_ref, atol=1e-5, rtol=1e-5), "f32 path mismatch"

    print("KERNEL_OK")
</pallas_src>

<mosaic_0001>
module attributes {stable_mosaic.version = 11 : i64} {
  func.func @_mlp_kernel(%arg0: i32, %arg1: i32, %arg2: memref<8x128xbf16, #tpu.memory_space<vmem>>, %arg3: memref<128x128xbf16, #tpu.memory_space<vmem>>, %arg4: memref<1x128xf32, #tpu.memory_space<vmem>>, %arg5: memref<128x128xbf16, #tpu.memory_space<vmem>>, %arg6: memref<1x128xf32, #tpu.memory_space<vmem>>, %arg7: memref<8x128xf32, #tpu.memory_space<vmem>>, %arg8: memref<8x128xf32, #tpu.memory_space<vmem>>) attributes {dimension_semantics = [#tpu.dimension_semantics<parallel>, #tpu.dimension_semantics<arbitrary>], iteration_bounds = array<i64: 1, 1>, scalar_prefetch = 0 : i64, scratch_operands = 1 : i64, tpu.core_type = #tpu.core_type<tc>, window_params = [{transform_indices = @transform_0, window_bounds = array<i64: 8, 128>}, {pipeline_mode = #tpu.pipeline_mode<synchronous>, transform_indices = @transform_1, window_bounds = array<i64: 128, 128>}, {pipeline_mode = #tpu.pipeline_mode<synchronous>, transform_indices = @transform_2, window_bounds = array<i64: 1, 128>}, {pipeline_mode = #tpu.pipeline_mode<synchronous>, transform_indices = @transform_3, window_bounds = array<i64: 128, 128>}, {pipeline_mode = #tpu.pipeline_mode<synchronous>, transform_indices = @transform_4, window_bounds = array<i64: 1, 128>}, {transform_indices = @transform_5, window_bounds = array<i64: 8, 128>}]} {
    %c0_i32 = arith.constant 0 : i32
    %0 = arith.cmpi eq, %arg1, %c0_i32 : i32
    %1 = arith.extui %0 : i1 to i32
    %c0_i32_0 = arith.constant 0 : i32
    %2 = arith.cmpi ne, %1, %c0_i32_0 : i32
    scf.if %2 {
      %cst_16 = arith.constant 0.000000e+00 : f32
      %20 = vector.broadcast %cst_16 : f32 to vector<8x128xf32>
      %c0_17 = arith.constant 0 : index
      %c0_18 = arith.constant 0 : index
      %21 = vector.load %arg8[%c0_17, %c0_18] : memref<8x128xf32, #tpu.memory_space<vmem>>, vector<8x128xf32>
      tpu.vector_store %arg8[%c0_17, %c0_18], %20 {strides = array<i32>} : memref<8x128xf32, #tpu.memory_space<vmem>>, vector<8x128xf32>,
    } else {
    }
    %c0 = arith.constant 0 : index
    %c0_1 = arith.constant 0 : index
    %3 = vector.load %arg2[%c0, %c0_1] : memref<8x128xbf16, #tpu.memory_space<vmem>>, vector<8x128xbf16>
    %c0_2 = arith.constant 0 : index
    %c0_3 = arith.constant 0 : index
    %4 = vector.load %arg3[%c0_2, %c0_3] : memref<128x128xbf16, #tpu.memory_space<vmem>>, vector<128x128xbf16>
    %cst = arith.constant dense<0.000000e+00> : vector<8x128xf32>
    %5 = tpu.matmul %3, %4, %cst {dimension_numbers = #tpu.dot_dimension_numbers<[1], [0], [0], [1], [0, 0, 1, 1], [], []>} : vector<8x128xbf16>, vector<128x128xbf16>, vector<8x128xf32> -> vector<8x128xf32>
    %c0_4 = arith.constant 0 : index
    %c0_5 = arith.constant 0 : index
    %6 = vector.load %arg4[%c0_4, %c0_5] : memref<1x128xf32, #tpu.memory_space<vmem>>, vector<1x128xf32>
    %7 = vector.broadcast %6 : vector<1x128xf32> to vector<8x128xf32>
    %8 = arith.addf %5, %7 : vector<8x128xf32>
    %cst_6 = arith.constant 0.000000e+00 : f32
    %9 = vector.broadcast %cst_6 : f32 to vector<8x128xf32>
    %10 = arith.maximumf %8, %9 : vector<8x128xf32>
    %c0_7 = arith.constant 0 : index
    %c0_8 = arith.constant 0 : index
    %11 = vector.load %arg8[%c0_7, %c0_8] : memref<8x128xf32, #tpu.memory_space<vmem>>, vector<8x128xf32>
    %12 = arith.truncf %10 : vector<8x128xf32> to vector<8x128xbf16>
    %c0_9 = arith.constant 0 : index
    %c0_10 = arith.constant 0 : index
    %13 = vector.load %arg5[%c0_9, %c0_10] : memref<128x128xbf16, #tpu.memory_space<vmem>>, vector<128x128xbf16>
    %cst_11 = arith.constant dense<0.000000e+00> : vector<8x128xf32>
    %14 = tpu.matmul %12, %13, %cst_11 {dimension_numbers = #tpu.dot_dimension_numbers<[1], [0], [0], [1], [0, 0, 1, 1], [], []>} : vector<8x128xbf16>, vector<128x128xbf16>, vector<8x128xf32> -> vector<8x128xf32>
    %15 = arith.addf %11, %14 : vector<8x128xf32>
    %c0_12 = arith.constant 0 : index
    %c0_13 = arith.constant 0 : index
    %16 = vector.load %arg8[%c0_12, %c0_13] : memref<8x128xf32, #tpu.memory_space<vmem>>, vector<8x128xf32>
    tpu.vector_store %arg8[%c0_12, %c0_13], %15 {strides = array<i32>} : memref<8x128xf32, #tpu.memory_space<vmem>>, vector<8x128xf32>,
    %c0_i32_14 = arith.constant 0 : i32
    %17 = arith.cmpi eq, %arg1, %c0_i32_14 : i32
    %18 = arith.extui %17 : i1 to i32
    %c0_i32_15 = arith.constant 0 : i32
    %19 = arith.cmpi ne, %18, %c0_i32_15 : i32
    scf.if %19 {
      %c0_16 = arith.constant 0 : index
      %c0_17 = arith.constant 0 : index
      %20 = vector.load %arg8[%c0_16, %c0_17] : memref<8x128xf32, #tpu.memory_space<vmem>>, vector<8x128xf32>
      %c0_18 = arith.constant 0 : index
      %c0_19 = arith.constant 0 : index
      %21 = vector.load %arg6[%c0_18, %c0_19] : memref<1x128xf32, #tpu.memory_space<vmem>>, vector<1x128xf32>
      %22 = vector.broadcast %21 : vector<1x128xf32> to vector<8x128xf32>
      %23 = arith.addf %20, %22 : vector<8x128xf32>
      %c0_20 = arith.constant 0 : index
      %c0_21 = arith.constant 0 : index
      %24 = vector.load %arg7[%c0_20, %c0_21] : memref<8x128xf32, #tpu.memory_space<vmem>>, vector<8x128xf32>
      tpu.vector_store %arg7[%c0_20, %c0_21], %23 {strides = array<i32>} : memref<8x128xf32, #tpu.memory_space<vmem>>, vector<8x128xf32>,
    } else {
    }
    return
  }
  func.func @transform_0(%arg0: i32, %arg1: i32) -> (i32, i32) {
    %c0_i32 = arith.constant 0 : i32
    %c0_i32_0 = arith.constant 0 : i32
    return %arg0, %c0_i32 : i32, i32
  }
  func.func @transform_1(%arg0: i32, %arg1: i32) -> (i32, i32) {
    %c0_i32 = arith.constant 0 : i32
    %c0_i32_0 = arith.constant 0 : i32
    return %c0_i32, %arg1 : i32, i32
  }
  func.func @transform_2(%arg0: i32, %arg1: i32) -> (i32, i32) {
    %c0_i32 = arith.constant 0 : i32
    %c0_i32_0 = arith.constant 0 : i32
    return %c0_i32, %arg1 : i32, i32
  }
  func.func @transform_3(%arg0: i32, %arg1: i32) -> (i32, i32) {
    %c0_i32 = arith.constant 0 : i32
    %c0_i32_0 = arith.constant 0 : i32
    return %arg1, %c0_i32 : i32, i32
  }
  func.func @transform_4(%arg0: i32, %arg1: i32) -> (i32, i32) {
    %c0_i32 = arith.constant 0 : i32
    %c0_i32_0 = arith.constant 0 : i32
    %c0_i32_1 = arith.constant 0 : i32
    return %c0_i32, %c0_i32_0 : i32, i32
  }
  func.func @transform_5(%arg0: i32, %arg1: i32) -> (i32, i32) {
    %c0_i32 = arith.constant 0 : i32
    %c0_i32_0 = arith.constant 0 : i32
    return %arg0, %c0_i32 : i32, i32
  }
}

module attributes {stable_mosaic.version = 11 : i64} {
  func.func @_mlp_kernel(%arg0: i32, %arg1: i32, %arg2: memref<8x128xbf16, #tpu.memory_space<vmem>>, %arg3: memref<128x128xbf16, #tpu.memory_space<vmem>>, %arg4: memref<1x128xf32, #tpu.memory_space<vmem>>, %arg5: memref<128x128xbf16, #tpu.memory_space<vmem>>, %arg6: memref<1x128xf32, #tpu.memory_space<vmem>>, %arg7: memref<8x128xf32, #tpu.memory_space<vmem>>, %arg8: memref<8x128xf32, #tpu.memory_space<vmem>>) attributes {dimension_semantics = [#tpu.dimension_semantics<parallel>, #tpu.dimension_semantics<arbitrary>], iteration_bounds = array<i64: 1, 1>, scalar_prefetch = 0 : i64, scratch_operands = 1 : i64, tpu.core_type = #tpu.core_type<tc>, window_params = [{transform_indices = @transform_0, window_bounds = array<i64: 8, 128>}, {transform_indices = @transform_1, window_bounds = array<i64: 128, 128>}, {transform_indices = @transform_2, window_bounds = array<i64: 1, 128>}, {transform_indices = @transform_3, window_bounds = array<i64: 128, 128>}, {pipeline_mode = #tpu.pipeline_mode<synchronous>, transform_indices = @transform_4, window_bounds = array<i64: 1, 128>}, {transform_indices = @transform_5, window_bounds = array<i64: 8, 128>}]} {
    %c0_i32 = arith.constant 0 : i32
    %0 = arith.cmpi eq, %arg1, %c0_i32 : i32
    %1 = arith.extui %0 : i1 to i32
    %c0_i32_0 = arith.constant 0 : i32
    %2 = arith.cmpi ne, %1, %c0_i32_0 : i32
    scf.if %2 {
      %cst_16 = arith.constant 0.000000e+00 : f32
      %20 = vector.broadcast %cst_16 : f32 to vector<8x128xf32>
      %c0_17 = arith.constant 0 : index
      %c0_18 = arith.constant 0 : index
      %21 = vector.load %arg8[%c0_17, %c0_18] : memref<8x128xf32, #tpu.memory_space<vmem>>, vector<8x128xf32>
      tpu.vector_store %arg8[%c0_17, %c0_18], %20 {strides = array<i32>} : memref<8x128xf32, #tpu.memory_space<vmem>>, vector<8x128xf32>,
    } else {
    }
    %c0 = arith.constant 0 : index
    %c0_1 = arith.constant 0 : index
    %3 = vector.load %arg2[%c0, %c0_1] : memref<8x128xbf16, #tpu.memory_space<vmem>>, vector<8x128xbf16>
    %c0_2 = arith.constant 0 : index
    %c0_3 = arith.constant 0 : index
    %4 = vector.load %arg3[%c0_2, %c0_3] : memref<128x128xbf16, #tpu.memory_space<vmem>>, vector<128x128xbf16>
    %cst = arith.constant dense<0.000000e+00> : vector<8x128xf32>
    %5 = tpu.matmul %3, %4, %cst {dimension_numbers = #tpu.dot_dimension_numbers<[1], [0], [0], [1], [0, 0, 1, 1], [], []>} : vector<8x128xbf16>, vector<128x128xbf16>, vector<8x128xf32> -> vector<8x128xf32>
    %c0_4 = arith.constant 0 : index
    %c0_5 = arith.constant 0 : index
    %6 = vector.load %arg4[%c0_4, %c0_5] : memref<1x128xf32, #tpu.memory_space<vmem>>, vector<1x128xf32>
    %7 = vector.broadcast %6 : vector<1x128xf32> to vector<8x128xf32>
    %8 = arith.addf %5, %7 : vector<8x128xf32>
    %cst_6 = arith.constant 0.000000e+00 : f32
    %9 = vector.broadcast %cst_6 : f32 to vector<8x128xf32>
    %10 = arith.maximumf %8, %9 : vector<8x128xf32>
    %c0_7 = arith.constant 0 : index
    %c0_8 = arith.constant 0 : index
    %11 = vector.load %arg8[%c0_7, %c0_8] : memref<8x128xf32, #tpu.memory_space<vmem>>, vector<8x128xf32>
    %12 = arith.truncf %10 : vector<8x128xf32> to vector<8x128xbf16>
    %c0_9 = arith.constant 0 : index
    %c0_10 = arith.constant 0 : index
    %13 = vector.load %arg5[%c0_9, %c0_10] : memref<128x128xbf16, #tpu.memory_space<vmem>>, vector<128x128xbf16>
    %cst_11 = arith.constant dense<0.000000e+00> : vector<8x128xf32>
    %14 = tpu.matmul %12, %13, %cst_11 {dimension_numbers = #tpu.dot_dimension_numbers<[1], [0], [0], [1], [0, 0, 1, 1], [], []>} : vector<8x128xbf16>, vector<128x128xbf16>, vector<8x128xf32> -> vector<8x128xf32>
    %15 = arith.addf %11, %14 : vector<8x128xf32>
    %c0_12 = arith.constant 0 : index
    %c0_13 = arith.constant 0 : index
    %16 = vector.load %arg8[%c0_12, %c0_13] : memref<8x128xf32, #tpu.memory_space<vmem>>, vector<8x128xf32>
    tpu.vector_store %arg8[%c0_12, %c0_13], %15 {strides = array<i32>} : memref<8x128xf32, #tpu.memory_space<vmem>>, vector<8x128xf32>,
    %c0_i32_14 = arith.constant 0 : i32
    %17 = arith.cmpi eq, %arg1, %c0_i32_14 : i32
    %18 = arith.extui %17 : i1 to i32
    %c0_i32_15 = arith.constant 0 : i32
    %19 = arith.cmpi ne, %18, %c0_i32_15 : i32
    scf.if %19 {
      %c0_16 = arith.constant 0 : index
      %c0_17 = arith.constant 0 : index
      %20 = vector.load %arg8[%c0_16, %c0_17] : memref<8x128xf32, #tpu.memory_space<vmem>>, vector<8x128xf32>
      %c0_18 = arith.constant 0 : index
      %c0_19 = arith.constant 0 : index
      %21 = vector.load %arg6[%c0_18, %c0_19] : memref<1x128xf32, #tpu.memory_space<vmem>>, vector<1x128xf32>
      %22 = vector.broadcast %21 : vector<1x128xf32> to vector<8x128xf32>
      %23 = arith.addf %20, %22 : vector<8x128xf32>
      %c0_20 = arith.constant 0 : index
      %c0_21 = arith.constant 0 : index
      %24 = vector.load %arg7[%c0_20, %c0_21] : memref<8x128xf32, #tpu.memory_space<vmem>>, vector<8x128xf32>
      tpu.vector_store %arg7[%c0_20, %c0_21], %23 {strides = array<i32>} : memref<8x128xf32, #tpu.memory_space<vmem>>, vector<8x128xf32>,
    } else {
    }
    return
  }
  func.func @transform_0(%arg0: i32, %arg1: i32) -> (i32, i32) {
    %c0_i32 = arith.constant 0 : i32
    %c0_i32_0 = arith.constant 0 : i32
    return %arg0, %c0_i32 : i32, i32
  }
  func.func @transform_1(%arg0: i32, %arg1: i32) -> (i32, i32) {
    %c0_i32 = arith.constant 0 : i32
    %c0_i32_0 = arith.constant 0 : i32
    return %c0_i32, %arg1 : i32, i32
  }
  func.func @transform_2(%arg0: i32, %arg1: i32) -> (i32, i32) {
    %c0_i32 = arith.constant 0 : i32
    %c0_i32_0 = arith.constant 0 : i32
    return %c0_i32, %arg1 : i32, i32
  }
  func.func @transform_3(%arg0: i32, %arg1: i32) -> (i32, i32) {
    %c0_i32 = arith.constant 0 : i32
    %c0_i32_0 = arith.constant 0 : i32
    return %arg1, %c0_i32 : i32, i32
  }
  func.func @transform_4(%arg0: i32, %arg1: i32) -> (i32, i32) {
    %c0_i32 = arith.constant 0 : i32
    %c0_i32_0 = arith.constant 0 : i32
    %c0_i32_1 = arith.constant 0 : i32
    return %c0_i32, %c0_i32_0 : i32, i32
  }
  func.func @transform_5(%arg0: i32, %arg1: i32) -> (i32, i32) {
    %c0_i32 = arith.constant 0 : i32
    %c0_i32_0 = arith.constant 0 : i32
    return %arg0, %c0_i32 : i32, i32
  }
}

</mosaic_0001>

<bundles_post_ra>
// kernel: tpu_custom_call.1
= control target key start
LH: loop header
LB: loop body
LE: loop exit
PB: predicated region body
PF: predicated region fallthrough
CT: control target
= control target key end

     0   :  { %10 = vsyncpa [#allocation4], 0  ;;  %s558_s0 = inlined_call_operand.hbm [shape: bf16[8,128], index: 0, kind: input, shape index: {}]   ;;  %s559_s1 = inlined_call_operand.hbm [shape: bf16[128,128], index: 1, kind: input, shape index: {}]   ;;  %s560_s2 = inlined_call_operand.vmem [shape: f32[1,128], index: 2, kind: input, shape index: {}]   ;;  %s561_s3 = inlined_call_operand.hbm [shape: bf16[128,128], index: 3, kind: input, shape index: {}]   ;;  %s562_s4 = inlined_call_operand.vmem [shape: f32[1,128], index: 4, kind: input, shape index: {}]   ;;  %s563_s5 = inlined_call_operand.hbm [shape: f32[8,128], index: 5, kind: output, shape index: {}]  }
   0x1   :  { %11 = vsyncpa [#allocation7], 0 }
   0x2   :  { %12 = vsyncpa [#allocation5], 0  ;;  %s502_s18 = smov [#allocation6]  }
   0x3   :  { %s28_s19 = sshll.u32 %s502_s18, 4  ;;  %s29_s19 = int_to_ptr.vmem [resolvable:$true] %s28_s19 }
   0x4   :  { %s424_s20 = scalar_lea.vmem %s29_s19, 1024  ;;  %p429_p1 = scmp.lt.s32.totalorder %s29_s19, %s29_s19 }
   0x5   :  { %p425_p0 = scmp.ne.s32.totalorder %s29_s19, %s424_s20  ;;  %p430_p2 = scmp.lt.s32.totalorder %s424_s20, %s424_s20 }
   0x7   :  { %p431_p3 = por %p430_p2, %p429_p1 }
   0x9   :  { %p432_p4 = pnand %p431_p3, %p425_p0 }
   0xb   :  { %435 = shalt.err (!%p432_p4)
}
   0xc   :  { %s503_s21 = smov 64   ;;  %s504_s22 = smov 4  }
   0xd   :  { %34 = dma.hbm_to_vmem [thread:$0]  %s559_s1, 1024, %s29_s19, [#allocation7], %s503_s21, %s503_s21, %s504_s22  }
   0xe   :  { %s505_s25 = smov [#allocation3]   ;;  %s506_s27 = smov [#allocation8]  }
   0xf   :  { %s19_s26 = sshll.u32 %s505_s25, 4  ;;  %s42_s28 = sshll.u32 %s506_s27, 4  ;;  %s20_s26 = int_to_ptr.vmem [resolvable:$true] %s19_s26  ;;  %s43_s28 = int_to_ptr.vmem [resolvable:$true] %s42_s28 }
  0x10   :  { %s444_s29 = scalar_lea.vmem %s20_s26, 64  ;;  %p449_p6 = scmp.lt.s32.totalorder %s20_s26, %s20_s26 }
  0x11   :  { %p445_p5 = scmp.ne.s32.totalorder %s20_s26, %s444_s29  ;;  %p450_p7 = scmp.lt.s32.totalorder %s444_s29, %s444_s29 }
  0x13   :  { %p451_p8 = por %p450_p7, %p449_p6 }
  0x15   :  { %p452_p9 = pnand %p451_p8, %p445_p5 }
  0x17   :  { %455 = shalt.err (!%p452_p9)
}
  0x18   :  { %22 = dma.hbm_to_vmem [thread:$0]  %s558_s0, 64, %s20_s26, [#allocation4]  }
  0x19   :  { %s464_s7 = scalar_lea.vmem %s43_s28, 1024  ;;  %p469_p11 = scmp.lt.s32.totalorder %s43_s28, %s43_s28 }
  0x1a   :  { %p465_p10 = scmp.ne.s32.totalorder %s43_s28, %s464_s7  ;;  %p470_p12 = scmp.lt.s32.totalorder %s464_s7, %s464_s7 }
  0x1c   :  { %p471_p13 = por %p470_p12, %p469_p11 }
  0x1e   :  { %p472_p0 = pnand %p471_p13, %p465_p10 }
  0x20   :  { %475 = shalt.err (!%p472_p0)
}
  0x21   :  { %48 = dma.hbm_to_vmem [thread:$0]  %s561_s3, 1024, %s43_s28, [#allocation7], %s503_s21, %s503_s21, %s504_s22  }
  0x22   :  { %496 = dma.done.wait [#allocation4], 64  }
  0x23   :  { %497 = vsyncadd [#allocation4], 4294967232 }
  0x24   :  { %498 = dma.done.wait [#allocation7], 2048  }
  0x25   :  { %499 = vsyncadd [#allocation7], 4294965248  ;;  %v507_v0 = vmov 0.0   ;;  %vm508_vm0 = vmmov 0   ;;  %v400_v1 = vld [vmem:[#allocation6 + $0x38] sm:$0xff]   ;;  %v401_v2 = vld [vmem:[#allocation6 + $0x30] sm:$0xff]  }
  0x26   :  { %352 = vmatprep.subr.bf16.mxu0 %v507_v0  ;;  %368 = vmatprep.mubr.msk.bf16.mxu0 %vm508_vm0, %v507_v0  ;;  %v402_v3 = vld [vmem:[#allocation6 + $0x28] sm:$0xff]   ;;  %v408_v4 = vld [vmem:[#allocation8 + $0x38] sm:$0xff]   ;;  %v403_v5 = vld [vmem:[#allocation6 + $0x20] sm:$0xff]   ;;  %s509_s11 = smov [#allocation9]  }
  0x27   :  { %372 = vmatprep.subr.bf16.mxu1 %v507_v0  ;;  %388 = vmatprep.mubr.msk.bf16.mxu1 %vm508_vm0, %v507_v0  ;;  %v409_v6 = vld [vmem:[#allocation8 + $0x30] sm:$0xff]   ;;  %v404_v7 = vld [vmem:[#allocation6 + $0x18] sm:$0xff]   ;;  %v410_v8 = vld [vmem:[#allocation8 + $0x28] sm:$0xff]   ;;  %s306_s12 = sshll.u32 %s509_s11, 4  ;;  %s307_s12 = int_to_ptr.vmem [resolvable:$true] %s306_s12 }
  0x28   :  { %353 = vmatpush3.bf16.msra.mxu0 %v400_v1  ;;  %373 = vmatpush3.bf16.msra.mxu1 %v408_v4  ;;  %v405_v9 = vld [vmem:[#allocation6 + $0x10] sm:$0xff]   ;;  %v411_v10 = vld [vmem:[#allocation8 + $0x20] sm:$0xff]   ;;  %v406_v11 = vld [vmem:[#allocation6 + $0x8] sm:$0xff]   ;;  %p481_p2 = scmp.lt.s32.totalorder %s307_s12, %s307_s12 }
  0x29   :  { %354 = vmatprep.subr.bf16.mxu0 %v507_v0  ;;  %374 = vmatprep.subr.bf16.mxu1 %v507_v0  ;;  %v412_v12 = vld [vmem:[#allocation8 + $0x18] sm:$0xff]   ;;  %v407_v13 = vld [vmem:[#allocation6] sm:$0xff]   ;;  %v413_v14 = vld [vmem:[#allocation8 + $0x10] sm:$0xff]  }
  0x2a   :  { %v66_v15 = vld [vmem:[#allocation3] sm:$0xf]  ;;  %v414_v16 = vld [vmem:[#allocation8 + $0x8] sm:$0xff]   ;;  %v415_v17 = vld [vmem:[#allocation8] sm:$0xff]  }
  0x2b   :  { %v316_v18 = vld [vmem:[%s560_s2] ss:$0 sm:$0xff]  ;;  %s476_s2 = scalar_lea.vmem %s307_s12, 128 }
  0x2c   :  { %355 = vmatpush3.bf16.msra.mxu0 %v401_v2  ;;  %375 = vmatpush3.bf16.msra.mxu1 %v409_v6  ;;  %v333_v26 = vld [vmem:[%s562_s4] ss:$0 sm:$0xff]  ;;  %p477_p1 = scmp.ne.s32.totalorder %s307_s12, %s476_s2  ;;  %p482_p3 = scmp.lt.s32.totalorder %s476_s2, %s476_s2 }
  0x2d   :  { %356 = vmatprep.subr.bf16.mxu0 %v507_v0  ;;  %376 = vmatprep.subr.bf16.mxu1 %v507_v0 }
  0x2e   :  { %p483_p4 = por %p482_p3, %p481_p2 }
  0x30   :  { %357 = vmatpush3.bf16.msra.mxu0 %v402_v3  ;;  %377 = vmatpush3.bf16.msra.mxu1 %v410_v8  ;;  %p484_p5 = pnand %p483_p4, %p477_p1 }
  0x31   :  { %358 = vmatprep.subr.bf16.mxu0 %v507_v0  ;;  %378 = vmatprep.subr.bf16.mxu1 %v507_v0 }
  0x34   :  { %359 = vmatpush3.bf16.msra.mxu0 %v403_v5  ;;  %379 = vmatpush3.bf16.msra.mxu1 %v411_v10 }
  0x35   :  { %360 = vmatprep.subr.bf16.mxu0 %v507_v0  ;;  %380 = vmatprep.subr.bf16.mxu1 %v507_v0 }
  0x38   :  { %361 = vmatpush3.bf16.msra.mxu0 %v404_v7  ;;  %381 = vmatpush3.bf16.msra.mxu1 %v412_v12 }
  0x39   :  { %362 = vmatprep.subr.bf16.mxu0 %v507_v0  ;;  %382 = vmatprep.subr.bf16.mxu1 %v507_v0 }
  0x3c   :  { %363 = vmatpush3.bf16.msra.mxu0 %v405_v9  ;;  %383 = vmatpush3.bf16.msra.mxu1 %v413_v14 }
  0x3d   :  { %364 = vmatprep.subr.bf16.mxu0 %v507_v0  ;;  %384 = vmatprep.subr.bf16.mxu1 %v507_v0 }
  0x40   :  { %365 = vmatpush3.bf16.msra.mxu0 %v406_v11  ;;  %385 = vmatpush3.bf16.msra.mxu1 %v414_v16 }
  0x41   :  { %366 = vmatprep.subr.bf16.mxu0 %v507_v0  ;;  %386 = vmatprep.subr.bf16.mxu1 %v507_v0 }
  0x44   :  { %367 = vmatpush3.bf16.msra.mxu0 %v407_v13  ;;  %387 = vmatpush3.bf16.msra.mxu1 %v415_v17 }
  0x47   :  { %369 = vmatmul.mubr.bf16.vlgmr.msra.gmra.mxu0 %v66_v15 }
 0x107   :  { %v172_v19 = vpop.f32.mrf.mxu0 }
 0x108   :  { %v173_v20 = vadd.f32 %v316_v18, %v172_v19 }
 0x109   :  { %v370_v21 = vpop.f32.mrf.mxu0 }
 0x10a   :  { %v178_v22 = vmax.f32 %v173_v20, 0.0 }
 0x10b   :  { %v175_v23 = vpop.f32.mrf.mxu0 }
 0x10c   :  { %v180_v24 = vpack.c.bf16 %v178_v22, %v178_v22 }
 0x10d   :  { %v371_v25 = vpop.f32.mrf.mxu0 }
 0x10e   :  { %389 = vmatmul.mubr.bf16.vlgmr.msra.gmra.mxu1 %v180_v24 }
 0x1ce   :  { %v279_v27 = vpop.f32.mrf.mxu1 }
 0x1cf   :  { %v298_v28 = vadd.f32 %v333_v26, %v279_v27 }
 0x1d0   :  { %v390_v29 = vpop.f32.mrf.mxu1 }
 0x1d1   :  { %299 = vst [vmem:[#allocation9] sm:$0xff] %v298_v28 }
 0x1d2   :  { %v282_v30 = vpop.f32.mrf.mxu1 }
 0x1d3   :  { %487 = shalt.err (!%p484_p5)
}
 0x1d4   :  { %309 = dma.vmem_to_hbm [thread:$0]  %s307_s12, 128, %s563_s5, [#allocation5]   ;;  %v391_v31 = vpop.f32.mrf.mxu1 }
 0x1d5   :  { %500 = dma.done.wait [#allocation5], 128  }
 0x1d6   :  { %501 = vsyncadd [#allocation5], 4294967168 }
 0x1d7   :  { %313 = vsyncpa [#allocation4], 1 }
 0x1d8   :  { %314 = vsyncpa [#allocation7], 1 }
 0x1d9   :  { %315 = vsyncpa [#allocation5], 1 }

// kernel: tpu_custom_call.1
= control target key start
LH: loop header
LB: loop body
LE: loop exit
PB: predicated region body
PF: predicated region fallthrough
CT: control target
= control target key end

     0   :  { %10 = vsyncpa [#allocation4], 0  ;;  %s558_s0 = inlined_call_operand.hbm [shape: bf16[8,128], index: 0, kind: input, shape index: {}]   ;;  %s559_s1 = inlined_call_operand.hbm [shape: bf16[128,128], index: 1, kind: input, shape index: {}]   ;;  %s560_s2 = inlined_call_operand.vmem [shape: f32[1,128], index: 2, kind: input, shape index: {}]   ;;  %s561_s3 = inlined_call_operand.hbm [shape: bf16[128,128], index: 3, kind: input, shape index: {}]   ;;  %s562_s4 = inlined_call_operand.vmem [shape: f32[1,128], index: 4, kind: input, shape index: {}]   ;;  %s563_s5 = inlined_call_operand.hbm [shape: f32[8,128], index: 5, kind: output, shape index: {}]  }
   0x1   :  { %11 = vsyncpa [#allocation7], 0 }
   0x2   :  { %12 = vsyncpa [#allocation5], 0  ;;  %s502_s18 = smov [#allocation6]  }
   0x3   :  { %s28_s19 = sshll.u32 %s502_s18, 4  ;;  %s29_s19 = int_to_ptr.vmem [resolvable:$true] %s28_s19 }
   0x4   :  { %s424_s20 = scalar_lea.vmem %s29_s19, 1024  ;;  %p429_p1 = scmp.lt.s32.totalorder %s29_s19, %s29_s19 }
   0x5   :  { %p425_p0 = scmp.ne.s32.totalorder %s29_s19, %s424_s20  ;;  %p430_p2 = scmp.lt.s32.totalorder %s424_s20, %s424_s20 }
   0x7   :  { %p431_p3 = por %p430_p2, %p429_p1 }
   0x9   :  { %p432_p4 = pnand %p431_p3, %p425_p0 }
   0xb   :  { %435 = shalt.err (!%p432_p4)
}
   0xc   :  { %s503_s21 = smov 64   ;;  %s504_s22 = smov 4  }
   0xd   :  { %34 = dma.hbm_to_vmem [thread:$0]  %s559_s1, 1024, %s29_s19, [#allocation7], %s503_s21, %s503_s21, %s504_s22  }
   0xe   :  { %s505_s25 = smov [#allocation3]   ;;  %s506_s27 = smov [#allocation8]  }
   0xf   :  { %s19_s26 = sshll.u32 %s505_s25, 4  ;;  %s42_s28 = sshll.u32 %s506_s27, 4  ;;  %s20_s26 = int_to_ptr.vmem [resolvable:$true] %s19_s26  ;;  %s43_s28 = int_to_ptr.vmem [resolvable:$true] %s42_s28 }
  0x10   :  { %s444_s29 = scalar_lea.vmem %s20_s26, 64  ;;  %p449_p6 = scmp.lt.s32.totalorder %s20_s26, %s20_s26 }
  0x11   :  { %p445_p5 = scmp.ne.s32.totalorder %s20_s26, %s444_s29  ;;  %p450_p7 = scmp.lt.s32.totalorder %s444_s29, %s444_s29 }
  0x13   :  { %p451_p8 = por %p450_p7, %p449_p6 }
  0x15   :  { %p452_p9 = pnand %p451_p8, %p445_p5 }
  0x17   :  { %455 = shalt.err (!%p452_p9)
}
  0x18   :  { %22 = dma.hbm_to_vmem [thread:$0]  %s558_s0, 64, %s20_s26, [#allocation4]  }
  0x19   :  { %s464_s7 = scalar_lea.vmem %s43_s28, 1024  ;;  %p469_p11 = scmp.lt.s32.totalorder %s43_s28, %s43_s28 }
  0x1a   :  { %p465_p10 = scmp.ne.s32.totalorder %s43_s28, %s464_s7  ;;  %p470_p12 = scmp.lt.s32.totalorder %s464_s7, %s464_s7 }
  0x1c   :  { %p471_p13 = por %p470_p12, %p469_p11 }
  0x1e   :  { %p472_p0 = pnand %p471_p13, %p465_p10 }
  0x20   :  { %475 = shalt.err (!%p472_p0)
}
  0x21   :  { %48 = dma.hbm_to_vmem [thread:$0]  %s561_s3, 1024, %s43_s28, [#allocation7], %s503_s21, %s503_s21, %s504_s22  }
  0x22   :  { %496 = dma.done.wait [#allocation4], 64  }
  0x23   :  { %497 = vsyncadd [#allocation4], 4294967232 }
  0x24   :  { %498 = dma.done.wait [#allocation7], 2048  }
  0x25   :  { %499 = vsyncadd [#allocation7], 4294965248  ;;  %v507_v0 = vmov 0.0   ;;  %vm508_vm0 = vmmov 0   ;;  %v400_v1 = vld [vmem:[#allocation6 + $0x38] sm:$0xff]   ;;  %v401_v2 = vld [vmem:[#allocation6 + $0x30] sm:$0xff]  }
  0x26   :  { %352 = vmatprep.subr.bf16.mxu0 %v507_v0  ;;  %368 = vmatprep.mubr.msk.bf16.mxu0 %vm508_vm0, %v507_v0  ;;  %v402_v3 = vld [vmem:[#allocation6 + $0x28] sm:$0xff]   ;;  %v408_v4 = vld [vmem:[#allocation8 + $0x38] sm:$0xff]   ;;  %v403_v5 = vld [vmem:[#allocation6 + $0x20] sm:$0xff]   ;;  %s509_s11 = smov [#allocation9]  }
  0x27   :  { %372 = vmatprep.subr.bf16.mxu1 %v507_v0  ;;  %388 = vmatprep.mubr.msk.bf16.mxu1 %vm508_vm0, %v507_v0  ;;  %v409_v6 = vld [vmem:[#allocation8 + $0x30] sm:$0xff]   ;;  %v404_v7 = vld [vmem:[#allocation6 + $0x18] sm:$0xff]   ;;  %v410_v8 = vld [vmem:[#allocation8 + $0x28] sm:$0xff]   ;;  %s306_s12 = sshll.u32 %s509_s11, 4  ;;  %s307_s12 = int_to_ptr.vmem [resolvable:$true] %s306_s12 }
  0x28   :  { %353 = vmatpush3.bf16.msra.mxu0 %v400_v1  ;;  %373 = vmatpush3.bf16.msra.mxu1 %v408_v4  ;;  %v405_v9 = vld [vmem:[#allocation6 + $0x10] sm:$0xff]   ;;  %v411_v10 = vld [vmem:[#allocation8 + $0x20] sm:$0xff]   ;;  %v406_v11 = vld [vmem:[#allocation6 + $0x8] sm:$0xff]   ;;  %p481_p2 = scmp.lt.s32.totalorder %s307_s12, %s307_s12 }
  0x29   :  { %354 = vmatprep.subr.bf16.mxu0 %v507_v0  ;;  %374 = vmatprep.subr.bf16.mxu1 %v507_v0  ;;  %v412_v12 = vld [vmem:[#allocation8 + $0x18] sm:$0xff]   ;;  %v407_v13 = vld [vmem:[#allocation6] sm:$0xff]   ;;  %v413_v14 = vld [vmem:[#allocation8 + $0x10] sm:$0xff]  }
  0x2a   :  { %v66_v15 = vld [vmem:[#allocation3] sm:$0xf]  ;;  %v414_v16 = vld [vmem:[#allocation8 + $0x8] sm:$0xff]   ;;  %v415_v17 = vld [vmem:[#allocation8] sm:$0xff]  }
  0x2b   :  { %v316_v18 = vld [vmem:[%s560_s2] ss:$0 sm:$0xff]  ;;  %s476_s2 = scalar_lea.vmem %s307_s12, 128 }
  0x2c   :  { %355 = vmatpush3.bf16.msra.mxu0 %v401_v2  ;;  %375 = vmatpush3.bf16.msra.mxu1 %v409_v6  ;;  %v333_v26 = vld [vmem:[%s562_s4] ss:$0 sm:$0xff]  ;;  %p477_p1 = scmp.ne.s32.totalorder %s307_s12, %s476_s2  ;;  %p482_p3 = scmp.lt.s32.totalorder %s476_s2, %s476_s2 }
  0x2d   :  { %356 = vmatprep.subr.bf16.mxu0 %v507_v0  ;;  %376 = vmatprep.subr.bf16.mxu1 %v507_v0 }
  0x2e   :  { %p483_p4 = por %p482_p3, %p481_p2 }
  0x30   :  { %357 = vmatpush3.bf16.msra.mxu0 %v402_v3  ;;  %377 = vmatpush3.bf16.msra.mxu1 %v410_v8  ;;  %p484_p5 = pnand %p483_p4, %p477_p1 }
  0x31   :  { %358 = vmatprep.subr.bf16.mxu0 %v507_v0  ;;  %378 = vmatprep.subr.bf16.mxu1 %v507_v0 }
  0x34   :  { %359 = vmatpush3.bf16.msra.mxu0 %v403_v5  ;;  %379 = vmatpush3.bf16.msra.mxu1 %v411_v10 }
  0x35   :  { %360 = vmatprep.subr.bf16.mxu0 %v507_v0  ;;  %380 = vmatprep.subr.bf16.mxu1 %v507_v0 }
  0x38   :  { %361 = vmatpush3.bf16.msra.mxu0 %v404_v7  ;;  %381 = vmatpush3.bf16.msra.mxu1 %v412_v12 }
  0x39   :  { %362 = vmatprep.subr.bf16.mxu0 %v507_v0  ;;  %382 = vmatprep.subr.bf16.mxu1 %v507_v0 }
  0x3c   :  { %363 = vmatpush3.bf16.msra.mxu0 %v405_v9  ;;  %383 = vmatpush3.bf16.msra.mxu1 %v413_v14 }
  0x3d   :  { %364 = vmatprep.subr.bf16.mxu0 %v507_v0  ;;  %384 = vmatprep.subr.bf16.mxu1 %v507_v0 }
  0x40   :  { %365 = vmatpush3.bf16.msra.mxu0 %v406_v11  ;;  %385 = vmatpush3.bf16.msra.mxu1 %v414_v16 }
  0x41   :  { %366 = vmatprep.subr.bf16.mxu0 %v507_v0  ;;  %386 = vmatprep.subr.bf16.mxu1 %v507_v0 }
  0x44   :  { %367 = vmatpush3.bf16.msra.mxu0 %v407_v13  ;;  %387 = vmatpush3.bf16.msra.mxu1 %v415_v17 }
  0x47   :  { %369 = vmatmul.mubr.bf16.vlgmr.msra.gmra.mxu0 %v66_v15 }
 0x107   :  { %v172_v19 = vpop.f32.mrf.mxu0 }
 0x108   :  { %v173_v20 = vadd.f32 %v316_v18, %v172_v19 }
 0x109   :  { %v370_v21 = vpop.f32.mrf.mxu0 }
 0x10a   :  { %v178_v22 = vmax.f32 %v173_v20, 0.0 }
 0x10b   :  { %v175_v23 = vpop.f32.mrf.mxu0 }
 0x10c   :  { %v180_v24 = vpack.c.bf16 %v178_v22, %v178_v22 }
 0x10d   :  { %v371_v25 = vpop.f32.mrf.mxu0 }
 0x10e   :  { %389 = vmatmul.mubr.bf16.vlgmr.msra.gmra.mxu1 %v180_v24 }
 0x1ce   :  { %v279_v27 = vpop.f32.mrf.mxu1 }
 0x1cf   :  { %v298_v28 = vadd.f32 %v333_v26, %v279_v27 }
 0x1d0   :  { %v390_v29 = vpop.f32.mrf.mxu1 }
 0x1d1   :  { %299 = vst [vmem:[#allocation9] sm:$0xff] %v298_v28 }
 0x1d2   :  { %v282_v30 = vpop.f32.mrf.mxu1 }
 0x1d3   :  { %487 = shalt.err (!%p484_p5)
}
 0x1d4   :  { %309 = dma.vmem_to_hbm [thread:$0]  %s307_s12, 128, %s563_s5, [#allocation5]   ;;  %v391_v31 = vpop.f32.mrf.mxu1 }
 0x1d5   :  { %500 = dma.done.wait [#allocation5], 128  }
 0x1d6   :  { %501 = vsyncadd [#allocation5], 4294967168 }
 0x1d7   :  { %313 = vsyncpa [#allocation4], 1 }
 0x1d8   :  { %314 = vsyncpa [#allocation7], 1 }
 0x1d9   :  { %315 = vsyncpa [#allocation5], 1 }

</bundles_post_ra>
